<compile_context>
chip_gen: v6e
topology: v6e:2x2x1
jax: 0.10.0
libtpu: 0.0.40
codegen_flags: <defaults>
</compile_context>

<pallas_src>
import functools

import jax
import jax.numpy as jnp
from jax.experimental import pallas as pl
from jax.experimental.pallas import tpu as pltpu


def se_block_kernel(x_ref, w1_ref, w2_ref, o_ref, *, inv_hw):
    # Squeeze: f32-accumulated sum over the lane (spatial) axis, divided by
    # the TRUE spatial size.  The block spans the full HW extent, so no padded
    # lanes enter the reduction.
    avg = jnp.sum(x_ref[...], axis=-1, dtype=jnp.float32) * inv_hw     # (Bt, C)

    # Excitation: fc1 (no bias) + ReLU, fc2 (no bias) + sigmoid.  Tiny MXU
    # matmuls with f32 accumulation.
    h = jnp.dot(avg, w1_ref[...], preferred_element_type=jnp.float32)  # (Bt, Ch)
    h = jnp.maximum(h, 0.0)
    s = jnp.dot(h, w2_ref[...], preferred_element_type=jnp.float32)    # (Bt, C)
    s = jax.nn.sigmoid(s)

    # Scale: re-read x from the resident VMEM block (keeps register pressure
    # bounded across the FC region) and multiply in the input dtype.
    o_ref[...] = (x_ref[...] * s[:, :, None].astype(x_ref.dtype)).astype(o_ref.dtype)


def _round_up(x, m):
    return -(-x // m) * m


def se_block_pallas(x, w1_t, w2_t):
    """x: (B, C, H, W); w1_t: (C, C//ratio) = fc1.weight.T; w2_t: (C//ratio, C) = fc2.weight.T."""
    B, C, H, W = x.shape
    HW = H * W
    Ch = w1_t.shape[1]
    x_flat = x.reshape(B, C, HW)

    dtype_bytes = jnp.dtype(x.dtype).itemsize
    w_bytes = jnp.dtype(w1_t.dtype).itemsize

    # ---- generation-aware sizing -------------------------------------------
    try:
        info = pltpu.get_tpu_info()
        vmem_phys = int(getattr(info, "vmem_capacity_bytes", 64 * 1024 * 1024))
    except Exception:
        vmem_phys = 64 * 1024 * 1024  # conservative (v7x-like) fallback
    is_v7x_like = vmem_phys <= 64 * 1024 * 1024  # 64 MiB VMEM, 2 TCs per chip

    if is_v7x_like:
        block_budget = 36 * 1024 * 1024   # double-buffered in + out blocks
        vmem_cap = 46 * 1024 * 1024       # leave headroom out of 64 MiB
        min_steps = 2 if B > 1 else 1     # give both TensorCores work
    else:                                 # v5e / v6e: single TC, 128 MiB VMEM
        block_budget = 96 * 1024 * 1024
        vmem_cap = 100 * 1024 * 1024
        min_steps = 1

    # In-VMEM bytes per batch row (lane dim rounds to 128, sublane dim to the
    # dtype's packing), doubled for input+output and doubled again for the
    # double-buffered pipeline.
    sublane_mult = {4: 8, 2: 16, 1: 32}.get(dtype_bytes, 8)
    row_bytes = _round_up(C, sublane_mult) * _round_up(HW, 128) * dtype_bytes
    per_batch = 4 * row_bytes
    bt_cap = max(1, block_budget // per_batch)

    # Pick the number of grid steps first, then the batch tile.
    n_steps = max(min_steps, -(-B // bt_cap))
    if is_v7x_like and n_steps > 1 and n_steps % 2:
        n_steps += 1                       # even split across the 2 TensorCores
    n_steps = min(n_steps, B)
    Bt = -(-B // n_steps)
    # Prefer an exact divisor of B (no ragged last block) if it costs <=25% tile.
    best_div = 1
    for cand in range(Bt, 0, -1):
        if B % cand == 0:
            best_div = cand
            break
    if best_div * 4 >= Bt * 3:
        Bt = best_div
    grid = (pl.cdiv(B, Bt),)

    footprint = (per_batch * Bt                          # x in + out, double-buffered
                 + 2 * (C * Ch + Ch * C) * w_bytes)      # weights, double-buffered
    vmem_limit = int(min(max(footprint + 8 * 1024 * 1024, 32 * 1024 * 1024), vmem_cap))

    kernel = functools.partial(se_block_kernel, inv_hw=float(1.0 / HW))

    out_flat = pl.pallas_call(
        kernel,
        out_shape=jax.ShapeDtypeStruct((B, C, HW), x.dtype),
        grid_spec=pltpu.PrefetchScalarGridSpec(
            num_scalar_prefetch=0,
            grid=grid,
            in_specs=[
                # Last two block dims equal the full (C, HW) extents -> legal
                # even when they are not multiples of (8, 128); tail lanes are
                # masked by Mosaic (no wrapper-side pad / slice needed).
                pl.BlockSpec((Bt, C, HW), lambda b: (b, 0, 0)),
                pl.BlockSpec((C, Ch), lambda b: (0, 0)),
                pl.BlockSpec((Ch, C), lambda b: (0, 0)),
            ],
            out_specs=pl.BlockSpec((Bt, C, HW), lambda b: (b, 0, 0)),
        ),
        compiler_params=pltpu.CompilerParams(
            dimension_semantics=("parallel",),
            vmem_limit_bytes=vmem_limit,
        ),
    )(x_flat, w1_t, w2_t)

    return out_flat.reshape(B, C, H, W)


def se_block_ref(x, w1_t, w2_t):
    """Pure-JAX reference mirroring the PyTorch forward."""
    avg = jnp.mean(x.astype(jnp.float32), axis=(2, 3))            # (B, C)
    h = jnp.maximum(avg @ w1_t.astype(jnp.float32), 0.0)          # (B, C//r)
    s = jax.nn.sigmoid(h @ w2_t.astype(jnp.float32))              # (B, C)
    return (x.astype(jnp.float32) * s[:, :, None, None]).astype(x.dtype)


if __name__ == "__main__":
    # Small shapes that exercise the unpadded paths: HW = 225 (not a multiple
    # of 128) and B = 3 (prime -> ragged last batch block on the 2-step grid).
    B, C, H, W = 3, 8, 15, 15
    ratio = 4
    Ch = C // ratio

    key = jax.random.PRNGKey(0)
    kx, k1, k2 = jax.random.split(key, 3)

    x = jax.random.normal(kx, (B, C, H, W), dtype=jnp.float32)

    # PyTorch nn.Linear weights: fc1.weight (C//r, C), fc2.weight (C, C//r).
    # Deterministic synthetic init; pre-transposed for y = x @ W^T.
    w1 = jax.random.normal(k1, (Ch, C), dtype=jnp.float32) * 0.2   # fc1.weight
    w2 = jax.random.normal(k2, (C, Ch), dtype=jnp.float32) * 0.2   # fc2.weight
    w1_t = w1.T   # (C, Ch)
    w2_t = w2.T   # (Ch, C)

    out = se_block_pallas(x, w1_t, w2_t)
    out = jax.block_until_ready(out)

    ref = se_block_ref(x, w1_t, w2_t)
    assert out.shape == (B, C, H, W)
    assert jnp.allclose(out, ref, atol=1e-5, rtol=1e-5), "mismatch vs reference"

    print("KERNEL_OK")
</pallas_src>

<mosaic_0001>
module attributes {stable_mosaic.version = 11 : i64} {
  func.func @se_block_kernel(%arg0: i32, %arg1: memref<2x8x225xf32, #tpu.memory_space<vmem>>, %arg2: memref<8x2xf32, #tpu.memory_space<vmem>>, %arg3: memref<2x8xf32, #tpu.memory_space<vmem>>, %arg4: memref<2x8x225xf32, #tpu.memory_space<vmem>>) attributes {dimension_semantics = [#tpu.dimension_semantics<parallel>], iteration_bounds = array<i64: 2>, scalar_prefetch = 0 : i64, scratch_operands = 0 : i64, tpu.core_type = #tpu.core_type<tc>, window_params = [{transform_indices = @transform_0, window_bounds = array<i64: 2, 8, 225>}, {pipeline_mode = #tpu.pipeline_mode<synchronous>, transform_indices = @transform_1, window_bounds = array<i64: 8, 2>}, {pipeline_mode = #tpu.pipeline_mode<synchronous>, transform_indices = @transform_2, window_bounds = array<i64: 2, 8>}, {transform_indices = @transform_3, window_bounds = array<i64: 2, 8, 225>}]} {
    %c0 = arith.constant 0 : index
    %c0_0 = arith.constant 0 : index
    %c0_1 = arith.constant 0 : index
    %0 = vector.load %arg1[%c0, %c0_0, %c0_1] : memref<2x8x225xf32, #tpu.memory_space<vmem>>, vector<2x8x225xf32>
    %cst = arith.constant dense<0.000000e+00> : vector<2x8xf32>
    %1 = vector.multi_reduction <add>, %0, %cst [2] : vector<2x8x225xf32> to vector<2x8xf32>
    %cst_2 = arith.constant 0.00444444455 : f32
    %2 = vector.broadcast %cst_2 : f32 to vector<2x8xf32>
    %3 = arith.mulf %1, %2 : vector<2x8xf32>
    %c0_3 = arith.constant 0 : index
    %c0_4 = arith.constant 0 : index
    %4 = vector.load %arg2[%c0_3, %c0_4] : memref<8x2xf32, #tpu.memory_space<vmem>>, vector<8x2xf32>
    %cst_5 = arith.constant dense<0.000000e+00> : vector<2x2xf32>
    %5 = tpu.matmul %3, %4, %cst_5 {dimension_numbers = #tpu.dot_dimension_numbers<[1], [0], [0], [1], [0, 0, 1, 1], [], []>} : vector<2x8xf32>, vector<8x2xf32>, vector<2x2xf32> -> vector<2x2xf32>
    %cst_6 = arith.constant 0.000000e+00 : f32
    %6 = vector.broadcast %cst_6 : f32 to vector<2x2xf32>
    %7 = arith.maximumf %5, %6 : vector<2x2xf32>
    %c0_7 = arith.constant 0 : index
    %c0_8 = arith.constant 0 : index
    %8 = vector.load %arg3[%c0_7, %c0_8] : memref<2x8xf32, #tpu.memory_space<vmem>>, vector<2x8xf32>
    %cst_9 = arith.constant dense<0.000000e+00> : vector<2x8xf32>
    %9 = tpu.matmul %7, %8, %cst_9 {dimension_numbers = #tpu.dot_dimension_numbers<[1], [0], [0], [1], [0, 0, 1, 1], [], []>} : vector<2x2xf32>, vector<2x8xf32>, vector<2x8xf32> -> vector<2x8xf32>
    %10 = arith.negf %9 : vector<2x8xf32>
    %11 = math.exp %10 : vector<2x8xf32>
    %cst_10 = arith.constant 1.000000e+00 : f32
    %12 = vector.broadcast %cst_10 : f32 to vector<2x8xf32>
    %13 = arith.addf %12, %11 : vector<2x8xf32>
    %14 = arith.divf %12, %13 : vector<2x8xf32>
    %c0_11 = arith.constant 0 : index
    %c0_12 = arith.constant 0 : index
    %c0_13 = arith.constant 0 : index
    %15 = vector.load %arg1[%c0_11, %c0_12, %c0_13] : memref<2x8x225xf32, #tpu.memory_space<vmem>>, vector<2x8x225xf32>
    %16 = vector.shape_cast %14 : vector<2x8xf32> to vector<2x8x1xf32>
    %17 = vector.broadcast %16 : vector<2x8x1xf32> to vector<2x8x225xf32>
    %18 = arith.mulf %15, %17 : vector<2x8x225xf32>
    %c0_14 = arith.constant 0 : index
    %c0_15 = arith.constant 0 : index
    %c0_16 = arith.constant 0 : index
    %19 = vector.load %arg4[%c0_14, %c0_15, %c0_16] : memref<2x8x225xf32, #tpu.memory_space<vmem>>, vector<2x8x225xf32>
    tpu.vector_store %arg4[%c0_14, %c0_15, %c0_16], %18 {strides = array<i32>} : memref<2x8x225xf32, #tpu.memory_space<vmem>>, vector<2x8x225xf32>,
    return
  }
  func.func @transform_0(%arg0: i32) -> (i32, i32, i32) {
    %c0_i32 = arith.constant 0 : i32
    %c0_i32_0 = arith.constant 0 : i32
    %c0_i32_1 = arith.constant 0 : i32
    return %arg0, %c0_i32, %c0_i32_0 : i32, i32, i32
  }
  func.func @transform_1(%arg0: i32) -> (i32, i32) {
    %c0_i32 = arith.constant 0 : i32
    %c0_i32_0 = arith.constant 0 : i32
    %c0_i32_1 = arith.constant 0 : i32
    return %c0_i32, %c0_i32_0 : i32, i32
  }
  func.func @transform_2(%arg0: i32) -> (i32, i32) {
    %c0_i32 = arith.constant 0 : i32
    %c0_i32_0 = arith.constant 0 : i32
    %c0_i32_1 = arith.constant 0 : i32
    return %c0_i32, %c0_i32_0 : i32, i32
  }
  func.func @transform_3(%arg0: i32) -> (i32, i32, i32) {
    %c0_i32 = arith.constant 0 : i32
    %c0_i32_0 = arith.constant 0 : i32
    %c0_i32_1 = arith.constant 0 : i32
    return %arg0, %c0_i32, %c0_i32_0 : i32, i32, i32
  }
}

</mosaic_0001>

<bundles_post_ra>
// kernel: tpu_custom_call.1
= control target key start
LH: loop header
LB: loop body
LE: loop exit
PB: predicated region body
PF: predicated region fallthrough
CT: control target
= control target key end

     0   :  { %8 = vsyncpa [#allocation3], 0  ;;  %s916_s0 = inlined_call_operand.hbm [shape: f32[3,8,225], index: 0, kind: input, shape index: {}]   ;;  %s917_s1 = inlined_call_operand.vmem [shape: f32[8,2], index: 1, kind: input, shape index: {}]   ;;  %s918_s2 = inlined_call_operand.vmem [shape: f32[2,8], index: 2, kind: input, shape index: {}]   ;;  %s919_s3 = inlined_call_operand.hbm [shape: f32[3,8,225], index: 3, kind: output, shape index: {}]  }
   0x1   :  { %10 = vsyncpa [#allocation3 + $0x1], 0 }
   0x2   :  { %11 = vsyncpa [#allocation4], 0 }
   0x3   :  { %13 = vsyncpa [#allocation4 + $0x1], 0  ;;  %s734_s12 = smov 0   ;;  %s736_s13 = smov 0  }
   0x4   :  { %s738_s14 = smov 0   ;;  %s740_s15 = smov 0  }
   0x5 LB: > { %s755_s16 = sadd.s32 4294967295, %s704_s15   ;;  %s515_s17 = sadd.s32 4294967294, %s704_s15   ;;  %s704_s15 = sphi %s740_s15, %s929_s15   ;;  %s700_s14 = sphi %s738_s14, %s928_s14   ;;  %s696_s13 = sphi %s736_s13, %s927_s13   ;;  %s692_s12 = sphi %s734_s12, %s926_s12  }
   0x6   : > { %s759_s18 = sadd.s32 1, %s704_s15   ;;  %s26_s19 = sadd.s32 1, %s700_s14 }
   0x7   : > { %s23_s20 = ssub.s32 %s704_s15, %s759_s18  ;;  %p33_p0 = scmp.ne.s32.totalorder %s700_s14, %s696_s13 }
   0x8   : > { %p24_p1 = scmp.eq.s32.totalorder %s23_s20, 0  ;;  %p34_p2 = scmp.eq.s32.totalorder %s704_s15, 0 }
   0x9   : > { %p39_p3 = scmp.ne.s32.totalorder %s696_s13, %s692_s12  ;;  %p40_p4 = scmp.eq.s32.totalorder %s755_s16, 0 }
   0xa   : > { %s771_s21 = scalar_select %p24_p1, %s700_s14, %s26_s19  }
   0xb   : > { %p35_p5 = por %p34_p2, %p33_p0  ;;  %p773_p6 = por %p40_p4, %p39_p3 }
   0xc   : > { %p105_p7 = scmp.eq.s32.totalorder %s755_s16, 1  ;;  %p111_p8 = scmp.eq.s32.totalorder %s515_s17, 1 }
   0xd   : > { %p920_p11 = scmp.ge.s32.totalorder %s704_s15, 2 }
   0xe   : > { %p778_p9 = por %p105_p7, %p33_p0  ;;  %p782_p10 = por %p111_p8, %p39_p3 }
   0xf   : > { %133 = sbr.rel (%p920_p11) target bundleno = 52 (0x34), region = 24 }
  0x10   : > { %s923_s24 = scalar_select %p782_p10, 1, 0 }
  0x14   : > { %136 = sbr.rel (!%p35_p5) target bundleno = 52 (0x34), region = 28  ;;  %s137_s25 = sand.u32 (%p35_p5), 1, %s700_s14  }
  0x15   : > { %s519_s26 = sshll.u32 (%p35_p5), %s704_s15, 1  ;;  %s518_s27 = sshll.u32 (%p35_p5), %s137_s25, 5 }
  0x16   : > { %s143_s28 = ssub.s32 (%p35_p5), 3, %s519_s26  ;;  %s794_s4 = scalar_lea.sflag (%p35_p5), [#allocation3], %s137_s25 }
  0x17   : > { %p144_p12 = scmp.lt.s32.totalorder (%p35_p5), %s143_s28, 2  ;;  %s141_s5 = scalar_lea.vmem (%p35_p5), [#allocation2], %s518_s27 }
  0x19   : > { %s931_s28 = smov (!%p144_p12, %s143_s28), 2 }
  0x1a   : > { %s791_s29 = sshll.u32 %s931_s28, 8 }
  0x1b   : > { %s149_s30 = ssub.s32 512, %s791_s29 }
  0x1c   : > { %150 = vsyncadd %s794_s4, %s149_s30  ;;  %p522_p13 = scmp.ne.s32.totalorder %s791_s29, 0  ;;  %s547_s6 = sshll.u32 %s704_s15, 9 }
  0x1d   : > { %s802_s9 = scalar_lea.hbm %s916_s0, %s547_s6  ;;  %s156_s10 = sshll.u32 %s141_s5, 4  ;;  %s804_s10 = int_to_ptr.vmem [resolvable:$true] %s156_s10 }
  0x1e   : > { %s614_s11 = scalar_lea.hbm %s802_s9, %s791_s29  ;;  %s618_s20 = scalar_lea.hbm %s916_s0, 768 }
  0x1f   : > { %p615_p0 = scmp.ne.s32.totalorder %s802_s9, %s614_s11  ;;  %p619_p3 = scmp.lt.s32.totalorder %s802_s9, %s916_s0 }
  0x20   : > { %p620_p4 = scmp.lt.s32.totalorder %s618_s20, %s614_s11 }
  0x21   : > { %p616_p1 = pnand %p615_p0, %p522_p13 }
  0x22   : > { %p621_p5 = por %p620_p4, %p619_p3 }
  0x23   : > { %p617_p2 = pneg %p616_p1 }
  0x25   : > { %p622_p7 = pnand %p621_p5, %p617_p2 }
  0x27   : > { %625 = shalt.err (!%p622_p7)
}
  0x28   : > { %s626_s27 = scalar_lea.vmem %s804_s10, %s791_s29  ;;  %s706_s28 = smov [#allocation2]  }
  0x29   : > { %p627_p8 = scmp.ne.s32.totalorder %s804_s10, %s626_s27  ;;  %s630_s30 = sshll.u32 %s706_s28, 4  ;;  %s631_s30 = int_to_ptr.vmem [resolvable:$false] %s630_s30 }
  0x2a   : > { %s632_s5 = scalar_lea.vmem %s631_s30, 1024  ;;  %p633_p1 = scmp.lt.s32.totalorder %s804_s10, %s631_s30 }
  0x2b   : > { %p628_p12 = pnand %p627_p8, %p522_p13  ;;  %p634_p11 = scmp.lt.s32.totalorder %s632_s5, %s626_s27 }
  0x2d   : > { %p629_p0 = pneg %p628_p12  ;;  %p635_p10 = por %p634_p11, %p633_p1 }
  0x2f   : > { %p636_p3 = pnand %p635_p10, %p629_p0 }
  0x31   : > { %639 = shalt.err (!%p636_p3)
}
  0x32   : > { %s707_s6 = smov 256   ;;  %s708_s7 = smov 16  }
  0x33   : > { %162 = dma.hbm_to_vmem [thread:$0]  (%p522_p13), %s802_s9, %s791_s29, %s804_s10, %s794_s4, %s707_s6, %s707_s6, %s708_s7  }
  0x34 PF: > { %p527_p2 = scmp.ge.s32.totalorder %s704_s15, 1  ;;  %p164_p4 = scmp.lt.s32.totalorder %s704_s15, 3 }
  0x36   : > { %p165_p5 = pnand %p527_p2, %p164_p4 }
  0x37   : > { %s833_s8 = sand.u32 (!%p165_p5), 1, %s696_s13  }
  0x38   : > { %168 = sbr.rel (%p165_p5) target bundleno = 784 (0x310), region = 32  ;;  %s528_s11 = sshll.u32 (!%p165_p5), %s833_s8, 5 }
  0x39   : > { %s171_s17 = scalar_lea.sflag (!%p165_p5), [#allocation3], %s833_s8  ;;  %s174_s19 = scalar_lea.vmem (!%p165_p5), [#allocation2], %s528_s11 }
  0x3d   : > { %683 = dma.done.wait (%p773_p6), %s171_s17, 512  }
  0x3e   : > { %685 = vsyncadd (%p773_p6), %s171_s17, 4294966784  ;;  %vm213_vm0 = vcmask 793600   ;;  %v209_v0 = vld [vmem:[%s174_s19] sm:$0xff]  ;;  %v210_v1 = vld [vmem:[%s174_s19 + $0x8] sm:$0xff]  ;;  %v709_v9 = vmov 0.0   ;;  %vm710_vm1 = vmmov 0   ;;  %v227_v10 = vlaneseq }
  0x3f   : > { %v214_v2 = vsel %vm213_vm0, %v210_v1, 0.0  ;;  %v211_v3 = vld [vmem:[%s174_s19 + $0x10] sm:$0xff]  ;;  %v212_v4 = vld [vmem:[%s174_s19 + $0x18] sm:$0xff]  ;;  %v224_v8 = vld [vmem:[%s917_s1] sm:$0xff]  ;;  %555 = vmatprep.subr.mxu0 %v709_v9  ;;  %557 = vmatprep.mubr.msk.f32.mxu0 %vm710_vm1, %v709_v9  ;;  %vm237_vm2 = vcmask 1041409   ;;  %vm239_vm3 = vcmask 64512  }
  0x40   : > { %v215_v5 = vadd.f32 %v214_v2, %v209_v0  ;;  %v218_v6 = vsel %vm213_vm0, %v212_v4, 0.0  ;;  %556 = vmatpush3.msra.mxu0 %v224_v8  ;;  %560 = vmatprep.subr.mxu1 %v709_v9  ;;  %v228_v11 = vand.u32 127, %v227_v10  ;;  %v230_v12 = vshrl.u32 %v227_v10, 7  ;;  %v313_v21 = vld [vmem:[%s918_s2] sm:$0x3]  ;;  %s196_s10 = scalar_lea.vmem [#allocation5], %s528_s11 }
  0x41   : > { %v219_v7 = vadd.f32 %v218_v6, %v211_v3  ;;  %562 = vmatprep.mubr.msk.f32.mxu1 %vm710_vm1, %v709_v9  ;;  %vm318_vm4 = vcmask 1041408   ;;  %vm314_vm5 = vcmask 15360   ;;  %s421_s20 = scalar_lea.sflag [#allocation4], %s833_s8  ;;  %s535_s25 = sshll.u32 (%p778_p9), %s755_s16, 1 }
  0x42   : > { %216 = vadd.xlane.f32.xlu0 %v215_v5  ;;  %v231_v14 = vsub.s32 %v228_v11, %v230_v12  ;;  %561 = vmatpush3.msk.msra.mxu1 %vm318_vm4, %v313_v21  ;;  %v400_v30 = vsub.s32 0, %v230_v12  ;;  %v407_v33 = vsub.s32 1, %v230_v12  ;;  %s429_s26 = ssub.s32 (%p778_p9), 3, %s535_s25 }
  0x43   : > { %p430_p6 = scmp.lt.s32.totalorder (%p778_p9), %s429_s26, 2 }
  0x46   : > { %220 = vadd.xlane.f32.xlu0 %v219_v7 }
  0xcb   : > { %v217_v13 = vpop.xlane.xlu0 %216 }
  0xcc   : > { %v222_v15 = vmul.f32 0.0044444446, %v217_v13 }
  0xce   : > { %v232_v18 = vrot.slane %v222_v15, %v231_v14 }
  0xcf   : > { %v221_v16 = vpop.xlane.xlu0 %220 }
  0xd0   : > { %v223_v17 = vmul.f32 0.0044444446, %v221_v16 }
  0xd2   : > { %v236_v19 = vrot.slane %v223_v17, %v231_v14 }
  0xd4   : > { %v238_v20 = vsel %vm237_vm2, %v236_v19, %v232_v18 }
  0xd5   : > { %558 = vmatmul.mubr.msk.f32.vlgmr.msra.gmra.mxu0 %vm239_vm3, %v238_v20 }
 0x195   : > { %v308_v22 = vpop.f32.mrf.mxu0 }
 0x196   : > { %v312_v23 = vmax.f32 %v308_v22, 0.0 }
 0x197   : > { %v559_v24 = vpop.f32.mrf.mxu0 }
 0x198   : > { %563 = vmatmul.mubr.msk.f32.vlgmr.msra.gmra.mxu1 %vm314_vm5, %v312_v23 }
 0x258   : > { %v388_v25 = vpop.f32.mrf.mxu1 }
 0x259   : > { %v533_v26 = vmul.f32 -1.442695, %v388_v25 }
 0x25a   : > { %v564_v27 = vpop.f32.mrf.mxu1 }
 0x25b   : > { %610 = vpow2.f32 %v533_v26 }
 0x268   : > { %v611_v28 = vpop.eup %610 }
 0x269   : > { %v395_v29 = vadd.f32 1.0, %v611_v28 }
 0x26b   : > { %612 = vrcp.f32 %v395_v29 }
 0x278   : > { %v613_v31 = vpop.eup %612 }
 0x279   : > { %v401_v32 = vrot.slane %v613_v31, %v400_v30  ;;  %v408_v34 = vrot.slane %v613_v31, %v407_v33 }
 0x27b   : > { %403 = vbcast.lane.b32.xlu1 %v401_v32, 256 }
 0x27f   : > { %410 = vbcast.lane.b32.xlu1 %v408_v34, 256 }
 0x2ed   : > { %v404_v35 = vpop.permute.xlu1 %403 }
 0x2ee   : > { %v412_v36 = vmul.f32 %v404_v35, %v209_v0  ;;  %v413_v37 = vmul.f32 %v404_v35, %v210_v1 }
 0x2f0   : > { %416 = vst [vmem:[%s196_s10] sm:$0xff] %v412_v36  ;;  %417 = vst.msk [vmem:[%s196_s10 + $0x8] sm:$0xff] %vm213_vm0, %v413_v37  ;;  %427 = sbr.rel (!%p778_p9) target bundleno = 784 (0x310), region = 40 }
 0x2f1   : > { %v411_v38 = vpop.permute.xlu1 %410 }
 0x2f2   : > { %v414_v39 = vmul.f32 %v411_v38, %v211_v3  ;;  %v415_v40 = vmul.f32 %v411_v38, %v212_v4 }
 0x2f4   : > { %418 = vst [vmem:[%s196_s10 + $0x10] sm:$0xff] %v414_v39  ;;  %419 = vst.msk [vmem:[%s196_s10 + $0x18] sm:$0xff] %vm213_vm0, %v415_v40 }
 0x2f5   : > { %s933_s26 = smov (!%p430_p6, %s429_s26), 2 }
 0x2f6   : > { %s859_s27 = sshll.u32 %s933_s26, 8 }
 0x2f7   : > { %s435_s28 = ssub.s32 512, %s859_s27 }
 0x2f8   : > { %436 = vsyncadd %s421_s20, %s435_s28  ;;  %p538_p10 = scmp.ne.s32.totalorder %s859_s27, 0  ;;  %s550_s30 = sshll.u32 %s755_s16, 9 }
 0x2f9   : > { %s869_s6 = scalar_lea.hbm %s919_s3, %s550_s30  ;;  %s442_s7 = sshll.u32 %s196_s10, 4  ;;  %s871_s7 = int_to_ptr.vmem [resolvable:$true] %s442_s7 }
 0x2fa   : > { %s640_s11 = scalar_lea.vmem %s871_s7, %s859_s27  ;;  %s711_s17 = smov [#allocation5]  }
 0x2fb   : > { %p641_p9 = scmp.ne.s32.totalorder %s871_s7, %s640_s11  ;;  %s644_s19 = sshll.u32 %s711_s17, 4  ;;  %s645_s19 = int_to_ptr.vmem [resolvable:$false] %s644_s19 }
 0x2fc   : > { %s646_s16 = scalar_lea.vmem %s645_s19, 1024  ;;  %p647_p7 = scmp.lt.s32.totalorder %s871_s7, %s645_s19 }
 0x2fd   : > { %p642_p11 = pnand %p641_p9, %p538_p10  ;;  %p648_p8 = scmp.lt.s32.totalorder %s646_s16, %s640_s11 }
 0x2ff   : > { %p643_p13 = pneg %p642_p11  ;;  %p649_p12 = por %p648_p8, %p647_p7 }
 0x301   : > { %p650_p0 = pnand %p649_p12, %p643_p13 }
 0x303   : > { %653 = shalt.err (!%p650_p0)
}
 0x304   : > { %s654_s29 = scalar_lea.hbm %s869_s6, %s859_s27  ;;  %s658_s9 = scalar_lea.hbm %s919_s3, 768 }
 0x305   : > { %p655_p1 = scmp.ne.s32.totalorder %s869_s6, %s654_s29  ;;  %p659_p4 = scmp.lt.s32.totalorder %s869_s6, %s919_s3 }
 0x306   : > { %p660_p5 = scmp.lt.s32.totalorder %s658_s9, %s654_s29 }
 0x307   : > { %p656_p3 = pnand %p655_p1, %p538_p10 }
 0x308   : > { %p661_p6 = por %p660_p5, %p659_p4 }
 0x309   : > { %p657_p2 = pneg %p656_p3 }
 0x30b   : > { %p662_p9 = pnand %p661_p6, %p657_p2 }
 0x30d   : > { %665 = shalt.err (!%p662_p9)
}
 0x30e   : > { %s712_s26 = smov 256   ;;  %s713_s28 = smov 16  }
 0x30f   : > { %448 = dma.vmem_to_hbm [thread:$0]  (%p538_p10), %s871_s7, %s859_s27, %s869_s6, %s421_s20, %s712_s26, %s712_s26, %s713_s28  }
 0x310 PF: > { %s457_s30 = sand.u32 1, %s692_s12   ;;  %p924_p11 = scmp.ne.s32.totalorder %s923_s24, 0 }
 0x311   : > { %p925_p13 = scmp.ge.s32.totalorder %s704_s15, 2  ;;  %s458_s23 = scalar_lea.sflag [#allocation4], %s457_s30 }
 0x313   : > { %p568_p7 = pnand %p925_p13, %p924_p11 }
 0x315   : > { %p569_p8 = pneg %p568_p7 }
 0x317   : > { %687 = dma.done.wait (%p569_p8), %s458_s23, 512  }
 0x318   : > { %689 = vsyncadd (%p569_p8), %s458_s23, 4294966784  ;;  %p16_p12 = scmp.ge.s32.totalorder %s759_s18, 4   ;;  %s926_s12 = smov %s696_s13 }
 0x319   : > { %s927_s13 = smov %s700_s14  ;;  %s928_s14 = smov %s771_s21 }
 0x31a   : > { %s929_s15 = smov %s759_s18  ;;  %18 = sbr.rel (!%p16_p12) target bundleno = 5 (0x5), region = 77 }
 0x31f   :  { %463 = vsyncpa [#allocation3], 1 }
 0x320   :  { %465 = vsyncpa [#allocation3 + $0x1], 1 }
 0x321   :  { %466 = vsyncpa [#allocation4], 1 }
 0x322   :  { %468 = vsyncpa [#allocation4 + $0x1], 1 }

</bundles_post_ra>
